<compile_context>
chip_gen: v5e
topology: v5e:2x2
jax: 0.10.0
libtpu: 0.0.40
codegen_flags: <defaults>
</compile_context>

<pallas_src>
import functools
import math

import jax
import jax.numpy as jnp
from jax.experimental import pallas as pl
from jax.experimental.pallas import tpu as pltpu


# ----------------------------- kernels --------------------------------------


def _split_kernel(h_o_ref, h_c_ref, w_o_ref, w_c_ref, bias_ref, out_ref, *, half):
    # Two half-width MXU dots written to static lane slices of the output block.
    # This path is only taken when half % 128 == 0, so both stores are
    # lane-dense (unmasked vst).  Static slices on a VMEM ref are free.
    t_o = jnp.dot(h_o_ref[...], w_o_ref[...], preferred_element_type=jnp.float32)
    out_ref[:, :half] = (jnp.tanh(t_o) + bias_ref[:, :half]).astype(out_ref.dtype)
    t_c = jnp.dot(h_c_ref[...], w_c_ref[...], preferred_element_type=jnp.float32)
    out_ref[:, half:] = (jnp.tanh(t_c) + bias_ref[:, half:]).astype(out_ref.dtype)


def _padded_kernel(h_o_ref, h_c_ref, w_o_ref, w_c_ref, bias_ref, out_ref):
    # Fallback for half % 128 != 0: weights are zero-padded to (F, F) in the
    # wrapper so   h_o@[W_o|0] + h_c@[0|W_c] == [h_o@W_o | h_c@W_c]   exactly,
    # giving a single full-width lane-dense store (no masked half-width stores).
    t = jnp.dot(h_o_ref[...], w_o_ref[...], preferred_element_type=jnp.float32)
    t = t + jnp.dot(h_c_ref[...], w_c_ref[...], preferred_element_type=jnp.float32)
    out_ref[...] = (jnp.tanh(t) + bias_ref[...]).astype(out_ref.dtype)


# --------------------------- sizing helpers ----------------------------------


def _vmem_capacity_bytes():
    """Generation-aware physical VMEM (128 MiB on v5e/v6e, 64 MiB on v7x)."""
    try:
        info = pltpu.get_tpu_info()
        cap = getattr(info, "vmem_capacity_bytes", None)
        if cap:
            return int(cap)
    except Exception:
        pass
    return 64 * 1024 * 1024  # conservative default (v7x per-TC)


def _choose_tile_n(N, F, dtype_bytes, resident_bytes, budget_bytes):
    """Row-tile size: ~2 MiB per streamed operand block (amortizes the ~0.35us
    per-grid-step overhead, >85% of HBM roofline), capped so double-buffered
    streams + resident weights fit the VMEM budget and so there are >=4 grid
    steps when N allows (v7x megacore sharding)."""
    per_row = 3 * 2 * F * dtype_bytes                     # h_o + h_c + out, x2 buffers
    avail = max(budget_bytes - resident_bytes, per_row * 8)
    target = max(256, (2 * 1024 * 1024) // (F * dtype_bytes))
    tile = min(target, avail // per_row)
    parallel_cap = ((-(-N // 4) + 7) // 8) * 8            # round_up(cdiv(N,4), 8)
    n_pad = ((N + 7) // 8) * 8
    tile = min(tile, parallel_cap, n_pad)
    return int(max(8, (tile // 8) * 8))


# ------------------------------ wrapper ---------------------------------------


def temporal_encoding(h_o, h_c, w_o, w_c, bias, *, tile_n=None):
    N, F = h_o.shape
    half = F // 2
    assert h_c.shape == (N, F)
    assert w_o.shape == (F, half) and w_c.shape == (F, half)
    assert bias.shape == (F,)

    out_dtype = h_o.dtype
    dtype_bytes = jnp.dtype(out_dtype).itemsize
    bias2d = bias.reshape(1, F).astype(out_dtype)

    use_split = (half % 128 == 0)
    if use_split:
        kernel = functools.partial(_split_kernel, half=half)
        w_o_arg, w_c_arg = w_o, w_c
        w_block_shape = (F, half)
        weight_elems = 2 * F * half
        flops = 2 * N * F * F                 # two (N,F)x(F,F/2) dots
    else:
        kernel = _padded_kernel
        w_o_arg = jnp.concatenate([w_o, jnp.zeros((F, F - half), w_o.dtype)], axis=1)
        w_c_arg = jnp.concatenate([jnp.zeros((F, F - half), w_c.dtype), w_c], axis=1)
        w_block_shape = (F, F)
        weight_elems = 2 * F * F
        flops = 4 * N * F * F                 # two (N,F)x(F,F) dots

    # Generation-aware scoped-VMEM: ~96 MiB on 128 MiB parts, ~48 MiB on v7x.
    vmem_cap = _vmem_capacity_bytes()
    vmem_limit = max(min((vmem_cap * 3) // 4, 96 * 1024 * 1024), 32 * 1024 * 1024)

    # Pallas double-buffers every BlockSpec (including the constant-index
    # resident weight/bias specs), so budget 2 copies.
    # NOTE: for very large F on v7x (resident weights >> budget) a contraction
    # -axis grid dim with a VMEM accumulator would be needed; not required at
    # the shapes this module is used with.
    resident_bytes = 2 * (weight_elems + F) * dtype_bytes

    if tile_n is None:
        tile_n = _choose_tile_n(N, F, dtype_bytes, resident_bytes,
                                budget_bytes=vmem_limit - 2 * 1024 * 1024)
    grid = (pl.cdiv(N, tile_n),)

    cost = pl.CostEstimate(
        flops=flops,
        transcendentals=N * F,                               # tanh
        bytes_accessed=(3 * N * F + weight_elems + F) * dtype_bytes,
    )

    return pl.pallas_call(
        kernel,
        out_shape=jax.ShapeDtypeStruct((N, F), out_dtype),
        grid_spec=pltpu.PrefetchScalarGridSpec(
            num_scalar_prefetch=0,
            grid=grid,
            in_specs=[
                pl.BlockSpec((tile_n, F), lambda i: (i, 0)),      # h_o row tiles (streamed)
                pl.BlockSpec((tile_n, F), lambda i: (i, 0)),      # h_c row tiles (streamed)
                pl.BlockSpec(w_block_shape, lambda i: (0, 0)),    # W_o (VMEM-resident)
                pl.BlockSpec(w_block_shape, lambda i: (0, 0)),    # W_c (VMEM-resident)
                pl.BlockSpec((1, F), lambda i: (0, 0)),           # bias (VMEM-resident)
            ],
            out_specs=pl.BlockSpec((tile_n, F), lambda i: (i, 0)),
        ),
        compiler_params=pltpu.CompilerParams(
            dimension_semantics=("parallel",),    # shards row tiles on v7x's 2 TCs
            vmem_limit_bytes=int(vmem_limit),
        ),
        cost_estimate=cost,
    )(h_o, h_c, w_o_arg, w_c_arg, bias2d)


# --------------------------- init / reference ---------------------------------


def xavier_uniform(key, shape, gain):
    fan_in, fan_out = shape
    bound = gain * math.sqrt(6.0 / (fan_in + fan_out))
    return jax.random.uniform(key, shape, jnp.float32, -bound, bound)


def reference(h_o, h_c, w_o, w_c, bias):
    hi = jax.lax.Precision.HIGHEST
    out = jnp.tanh(jnp.concatenate(
        [jnp.dot(h_o, w_o, precision=hi), jnp.dot(h_c, w_c, precision=hi)], axis=1))
    return out + bias


# --------------------------------- main ---------------------------------------


if __name__ == "__main__":
    key = jax.random.PRNGKey(0)

    def run_case(case_key, N, F):
        k1, k2, k3, k4, k5 = jax.random.split(case_key, 5)
        half = F // 2
        # Deterministic parameter init mirroring the module's __init__.
        w_o = xavier_uniform(k1, (F, half), gain=1.667)
        w_c = xavier_uniform(k2, (F, half), gain=1.667)
        stdv = 1.0 / math.sqrt(F)
        bias = jax.random.uniform(k3, (F,), jnp.float32, -stdv, stdv)
        h_o = jax.random.normal(k4, (N, F), jnp.float32)
        h_c = jax.random.normal(k5, (N, F), jnp.float32)

        out = jax.block_until_ready(temporal_encoding(h_o, h_c, w_o, w_c, bias))
        ref = reference(h_o, h_c, w_o, w_c, bias)
        assert out.shape == (N, F)
        assert jnp.allclose(out, ref, atol=2e-5, rtol=2e-5), f"mismatch N={N} F={F}"

    k_a, k_b = jax.random.split(key)
    run_case(k_a, N=8, F=32)     # small-F module shape -> padded full-width fallback
    run_case(k_b, N=16, F=256)   # F/2 % 128 == 0 -> half-width split-dot path

    print("KERNEL_OK")
</pallas_src>

<mosaic_0001>
module attributes {stable_mosaic.version = 11 : i64} {
  func.func @_padded_kernel(%arg0: i32, %arg1: memref<8x32xf32, #tpu.memory_space<vmem>>, %arg2: memref<8x32xf32, #tpu.memory_space<vmem>>, %arg3: memref<32x32xf32, #tpu.memory_space<vmem>>, %arg4: memref<32x32xf32, #tpu.memory_space<vmem>>, %arg5: memref<1x32xf32, #tpu.memory_space<vmem>>, %arg6: memref<8x32xf32, #tpu.memory_space<vmem>>) attributes {dimension_semantics = [#tpu.dimension_semantics<parallel>], iteration_bounds = array<i64: 1>, scalar_prefetch = 0 : i64, scratch_operands = 0 : i64, tpu.core_type = #tpu.core_type<tc>, window_params = [{transform_indices = @transform_0, window_bounds = array<i64: 8, 32>}, {transform_indices = @transform_1, window_bounds = array<i64: 8, 32>}, {pipeline_mode = #tpu.pipeline_mode<synchronous>, transform_indices = @transform_2, window_bounds = array<i64: 32, 32>}, {pipeline_mode = #tpu.pipeline_mode<synchronous>, transform_indices = @transform_3, window_bounds = array<i64: 32, 32>}, {pipeline_mode = #tpu.pipeline_mode<synchronous>, transform_indices = @transform_4, window_bounds = array<i64: 1, 32>}, {transform_indices = @transform_5, window_bounds = array<i64: 8, 32>}]} {
    %c0 = arith.constant 0 : index
    %c0_0 = arith.constant 0 : index
    %0 = vector.load %arg1[%c0, %c0_0] : memref<8x32xf32, #tpu.memory_space<vmem>>, vector<8x32xf32>
    %c0_1 = arith.constant 0 : index
    %c0_2 = arith.constant 0 : index
    %1 = vector.load %arg3[%c0_1, %c0_2] : memref<32x32xf32, #tpu.memory_space<vmem>>, vector<32x32xf32>
    %cst = arith.constant dense<0.000000e+00> : vector<8x32xf32>
    %2 = tpu.matmul %0, %1, %cst {dimension_numbers = #tpu.dot_dimension_numbers<[1], [0], [0], [1], [0, 0, 1, 1], [], []>} : vector<8x32xf32>, vector<32x32xf32>, vector<8x32xf32> -> vector<8x32xf32>
    %c0_3 = arith.constant 0 : index
    %c0_4 = arith.constant 0 : index
    %3 = vector.load %arg2[%c0_3, %c0_4] : memref<8x32xf32, #tpu.memory_space<vmem>>, vector<8x32xf32>
    %c0_5 = arith.constant 0 : index
    %c0_6 = arith.constant 0 : index
    %4 = vector.load %arg4[%c0_5, %c0_6] : memref<32x32xf32, #tpu.memory_space<vmem>>, vector<32x32xf32>
    %cst_7 = arith.constant dense<0.000000e+00> : vector<8x32xf32>
    %5 = tpu.matmul %3, %4, %cst_7 {dimension_numbers = #tpu.dot_dimension_numbers<[1], [0], [0], [1], [0, 0, 1, 1], [], []>} : vector<8x32xf32>, vector<32x32xf32>, vector<8x32xf32> -> vector<8x32xf32>
    %6 = arith.addf %2, %5 : vector<8x32xf32>
    %7 = math.tanh %6 : vector<8x32xf32>
    %c0_8 = arith.constant 0 : index
    %c0_9 = arith.constant 0 : index
    %8 = vector.load %arg5[%c0_8, %c0_9] : memref<1x32xf32, #tpu.memory_space<vmem>>, vector<1x32xf32>
    %9 = vector.broadcast %8 : vector<1x32xf32> to vector<8x32xf32>
    %10 = arith.addf %7, %9 : vector<8x32xf32>
    %c0_10 = arith.constant 0 : index
    %c0_11 = arith.constant 0 : index
    %11 = vector.load %arg6[%c0_10, %c0_11] : memref<8x32xf32, #tpu.memory_space<vmem>>, vector<8x32xf32>
    tpu.vector_store %arg6[%c0_10, %c0_11], %10 {strides = array<i32>} : memref<8x32xf32, #tpu.memory_space<vmem>>, vector<8x32xf32>,
    return
  }
  func.func @transform_0(%arg0: i32) -> (i32, i32) {
    %c0_i32 = arith.constant 0 : i32
    %c0_i32_0 = arith.constant 0 : i32
    return %arg0, %c0_i32 : i32, i32
  }
  func.func @transform_1(%arg0: i32) -> (i32, i32) {
    %c0_i32 = arith.constant 0 : i32
    %c0_i32_0 = arith.constant 0 : i32
    return %arg0, %c0_i32 : i32, i32
  }
  func.func @transform_2(%arg0: i32) -> (i32, i32) {
    %c0_i32 = arith.constant 0 : i32
    %c0_i32_0 = arith.constant 0 : i32
    %c0_i32_1 = arith.constant 0 : i32
    return %c0_i32, %c0_i32_0 : i32, i32
  }
  func.func @transform_3(%arg0: i32) -> (i32, i32) {
    %c0_i32 = arith.constant 0 : i32
    %c0_i32_0 = arith.constant 0 : i32
    %c0_i32_1 = arith.constant 0 : i32
    return %c0_i32, %c0_i32_0 : i32, i32
  }
  func.func @transform_4(%arg0: i32) -> (i32, i32) {
    %c0_i32 = arith.constant 0 : i32
    %c0_i32_0 = arith.constant 0 : i32
    %c0_i32_1 = arith.constant 0 : i32
    return %c0_i32, %c0_i32_0 : i32, i32
  }
  func.func @transform_5(%arg0: i32) -> (i32, i32) {
    %c0_i32 = arith.constant 0 : i32
    %c0_i32_0 = arith.constant 0 : i32
    return %arg0, %c0_i32 : i32, i32
  }
}

</mosaic_0001>

<bundles_post_ra>
// kernel: tpu_custom_call.1
= control target key start
LH: loop header
LB: loop body
LE: loop exit
PB: predicated region body
PF: predicated region fallthrough
CT: control target
= control target key end

     0   :  { %10 = vsyncpa [#allocation3], 0  ;;  %s361_s0 = inlined_call_operand.hbm [shape: f32[8,32], index: 0, kind: input, shape index: {}]   ;;  %s362_s1 = inlined_call_operand.hbm [shape: f32[8,32], index: 1, kind: input, shape index: {}]   ;;  %s363_s2 = inlined_call_operand.hbm [shape: f32[32,32], index: 2, kind: input, shape index: {}]   ;;  %s364_s3 = inlined_call_operand.hbm [shape: f32[32,32], index: 3, kind: input, shape index: {}]   ;;  %s365_s4 = inlined_call_operand.vmem [shape: f32[1,32], index: 4, kind: input, shape index: {}]   ;;  %s366_s5 = inlined_call_operand.hbm [shape: f32[8,32], index: 5, kind: output, shape index: {}]  }
   0x1   :  { %11 = vsyncpa [#allocation6], 0 }
   0x2   :  { %12 = vsyncpa [#allocation9], 0  ;;  %s30_s20 = sshll.u32 %s362_s1, 4  ;;  %s31_s20 = int_to_ptr.hbm [resolvable:$true] %s30_s20 }
   0x3   :  { %13 = vsyncpa [#allocation4], 0  ;;  %s303_s21 = smov [#allocation5]   ;;  %s19_s25 = sshll.u32 %s361_s0, 4  ;;  %s20_s25 = int_to_ptr.hbm [resolvable:$true] %s19_s25 }
   0x4   :  { %s32_s22 = sshll.u32 %s303_s21, 4  ;;  %s304_s26 = smov [#allocation2]   ;;  %s33_s22 = int_to_ptr.vmem [resolvable:$true] %s32_s22 }
   0x5   :  { %35 = dma.hbm_to_vmem [thread:$0]  %s31_s20, 128, %s33_s22, [#allocation6]  }
   0x6   :  { %s21_s27 = sshll.u32 %s304_s26, 4  ;;  %s40_s30 = sshll.u32 %s363_s2, 4  ;;  %s22_s27 = int_to_ptr.vmem [resolvable:$true] %s21_s27  ;;  %s41_s30 = int_to_ptr.hbm [resolvable:$true] %s40_s30 }
   0x7   :  { %24 = dma.hbm_to_vmem [thread:$0]  %s20_s25, 128, %s22_s27, [#allocation3]  }
   0x8   :  { %s305_s1 = smov [#allocation7]   ;;  %s53_s9 = sshll.u32 %s364_s3, 4  ;;  %s54_s9 = int_to_ptr.hbm [resolvable:$true] %s53_s9 }
   0x9   :  { %s42_s6 = sshll.u32 %s305_s1, 4  ;;  %s306_s10 = smov 128   ;;  %s43_s6 = int_to_ptr.vmem [resolvable:$true] %s42_s6 }
   0xa   :  { %s307_s0 = smov 8   ;;  %s308_s11 = smov [#allocation8]  }
   0xb   :  { %48 = dma.hbm_to_vmem [thread:$0]  %s41_s30, 512, %s43_s6, [#allocation6], %s306_s10, %s306_s10, %s307_s0  }
   0xc   :  { %s55_s12 = sshll.u32 %s308_s11, 4  ;;  %s56_s12 = int_to_ptr.vmem [resolvable:$true] %s55_s12 }
   0xd   :  { %61 = dma.hbm_to_vmem [thread:$0]  %s54_s9, 512, %s56_s12, [#allocation9], %s306_s10, %s306_s10, %s307_s0  }
   0xe   :  { %295 = dma.done.wait [#allocation3], 128  }
   0xf   :  { %296 = vsyncadd [#allocation3], 4294967168 }
  0x10   :  { %297 = dma.done.wait [#allocation6], 640  }
  0x11   :  { %298 = vsyncadd [#allocation6], 4294966656 }
  0x12   :  { %299 = dma.done.wait [#allocation9], 512  }
  0x13   :  { %300 = vsyncadd [#allocation9], 4294966784  ;;  %v89_v0 = vld [vmem:[#allocation8 + $0x18] sm:$0xff]  ;;  %v88_v2 = vld [vmem:[#allocation8 + $0x10] sm:$0xff]  ;;  %vm90_vm0 = vcmask 261120   ;;  %s309_s13 = smov [#allocation10]  }
  0x14   :  { %v84_v1 = vld [vmem:[#allocation7 + $0x18] sm:$0xff]  ;;  %106 = vmatpush.msra.mxu0 %v89_v0  ;;  %v83_v3 = vld [vmem:[#allocation7 + $0x10] sm:$0xff]  ;;  %v87_v4 = vld [vmem:[#allocation8 + $0x8] sm:$0xff]  ;;  %s149_s14 = sshll.u32 %s309_s13, 4  ;;  %s151_s17 = sshll.u32 %s366_s5, 4  ;;  %s150_s14 = int_to_ptr.vmem [resolvable:$true] %s149_s14  ;;  %s152_s17 = int_to_ptr.hbm [resolvable:$true] %s151_s17 }
  0x15   :  { %129 = vmatpush.msra.mxu1 %v84_v1  ;;  %v82_v5 = vld [vmem:[#allocation7 + $0x8] sm:$0xff]  ;;  %v86_v6 = vld [vmem:[#allocation8] sm:$0xff]  ;;  %v85_v8 = vld [vmem:[#allocation5] sm:$0xff] }
  0x16   :  { %107 = vmatpush.msra.mxu0 %v88_v2  ;;  %v81_v7 = vld [vmem:[#allocation7] sm:$0xff]  ;;  %v80_v9 = vld [vmem:[#allocation2] sm:$0xff] }
  0x17   :  { %130 = vmatpush.msra.mxu1 %v83_v3  ;;  %v172_v13 = vld [vmem:[%s365_s4] ss:$0 sm:$0xff] }
  0x18   :  { %108 = vmatpush.msra.mxu0 %v87_v4 }
  0x19   :  { %131 = vmatpush.msra.mxu1 %v82_v5 }
  0x1a   :  { %109 = vmatpush.msra.mxu0 %v86_v6 }
  0x1b   :  { %132 = vmatpush.msra.mxu1 %v81_v7  ;;  %163 = vmatmul.msk.f32.vlgmr.msra.gmra.mxu0 %vm90_vm0, %v85_v8 }
  0x1c   :  { %164 = vmatmul.msk.f32.vlgmr.msra.gmra.mxu1 %vm90_vm0, %v80_v9 }
  0x98   :  { %v111_v10 = vpop.f32.mrf.mxu0 }
  0x99   :  { %v134_v11 = vpop.f32.mrf.mxu1 }
  0x9a   :  { %v135_v12 = vadd.f32 %v134_v11, %v111_v10 }
  0x9c   :  { %173 = vtanh.f32 %v135_v12 }
  0xa2   :  { %v174_v14 = vpop.eup %173 }
  0xa3   :  { %v142_v15 = vadd.f32 %v174_v14, %v172_v13 }
  0xa5   :  { %143 = vst.msk [vmem:[#allocation10] sm:$0xff] %vm90_vm0, %v142_v15 }
  0xa6   :  { %154 = dma.vmem_to_hbm [thread:$0]  %s150_s14, 128, %s152_s17, [#allocation4]  }
  0xa7   :  { %301 = dma.done.wait [#allocation4], 128  }
  0xa8   :  { %302 = vsyncadd [#allocation4], 4294967168 }
  0xa9   :  { %159 = vsyncpa [#allocation3], 1 }
  0xaa   :  { %160 = vsyncpa [#allocation6], 1 }
  0xab   :  { %161 = vsyncpa [#allocation9], 1 }
  0xac   :  { %162 = vsyncpa [#allocation4], 1 }

</bundles_post_ra>
